<compile_context>
chip_gen: v6e
topology: v6e:2x2x1
jax: 0.10.0
libtpu: 0.0.40
codegen_flags: <defaults>
</compile_context>

<pallas_src>
import functools
from typing import NamedTuple

import jax
import jax.numpy as jnp
from jax.experimental import pallas as pl
from jax.experimental.pallas import tpu as pltpu


# --------------------------------------------------------------------------- #
# helpers
# --------------------------------------------------------------------------- #
def _cdiv(a, b):
    return -(-a // b)


def _round_up(x, m):
    return _cdiv(x, m) * m


def _vmem_budget_bytes():
    """~75% of physical VMEM: ~96 MiB on v5e/v6e (128 MiB), ~48 MiB on v7x (64 MiB)."""
    try:
        cap = int(pltpu.get_tpu_info().vmem_capacity_bytes)
    except Exception:
        cap = 64 << 20  # conservative fallback (v7x per-TensorCore)
    return (cap * 3) // 4


def _vmem_bytes(tm, tk, f_out_p, elt_mm, elt_out, use_acc):
    return (2 * tm * tk * elt_mm            # x tiles (double buffered)
            + 2 * tk * f_out_p * elt_mm     # weight blocks (double buffered)
            + 2 * tm * f_out_p * elt_out    # output tiles (double buffered)
            + 2 * 2 * f_out_p * 4           # merged gamma/beta
            + (tm * f_out_p * 4 if use_acc else 0))


# --------------------------------------------------------------------------- #
# kernel
# --------------------------------------------------------------------------- #
def _ln_relu_store(y, gb_ref, o_ref, *, eps, f_out_real, f_out_pad):
    """Two-pass LayerNorm over the real feature width + fused affine + ReLU."""
    inv_n = jnp.float32(1.0 / f_out_real)
    mean = jnp.sum(y, axis=-1, keepdims=True) * inv_n          # pad cols of y are 0
    centered = y - mean
    if f_out_pad != f_out_real:
        col = jax.lax.broadcasted_iota(jnp.int32, y.shape, dimension=y.ndim - 1)
        centered = jnp.where(col < f_out_real, centered, 0.0)
    var = jnp.sum(centered * centered, axis=-1, keepdims=True) * inv_n
    scale = gb_ref[0:1, :] * jax.lax.rsqrt(var + jnp.float32(eps))   # gamma / std
    o_ref[...] = jnp.maximum(centered * scale + gb_ref[1:2, :],
                             0.0).astype(o_ref.dtype)


def _lbrnn_kernel(x_ref, wt_ref, gb_ref, o_ref, *acc,
                  eps, f_out_real, f_out_pad, nk):
    acc_ref = acc[0] if acc else None

    # Linear (bias=False): (tm, tk) @ (tk, f_out_p) on the MXU, f32 accumulation.
    part = jnp.dot(x_ref[...], wt_ref[...], preferred_element_type=jnp.float32)

    if nk == 1:
        _ln_relu_store(part, gb_ref, o_ref, eps=eps,
                       f_out_real=f_out_real, f_out_pad=f_out_pad)
        return

    # Accumulate directly into the f32 output block (VMEM resident across k);
    # only fall back to a scratch accumulator when the output dtype is not f32.
    buf = o_ref if acc_ref is None else acc_ref
    k = pl.program_id(1)

    @pl.when(k == 0)
    def _first():
        buf[...] = part

    @pl.when(k > 0)
    def _accum():
        buf[...] += part

    @pl.when(k == nk - 1)
    def _epilogue():
        _ln_relu_store(buf[...], gb_ref, o_ref, eps=eps,
                       f_out_real=f_out_real, f_out_pad=f_out_pad)

    # TODO(synk): dropout (p > 0, training mode) not implemented; module default p=0.


# --------------------------------------------------------------------------- #
# wrapper
# --------------------------------------------------------------------------- #
class LBRNNParams(NamedTuple):
    wt: jax.Array        # (f_in_p, f_out_p): transposed, zero-padded, matmul dtype
    gb: jax.Array        # (2, f_out_p) f32: row 0 = gamma, row 1 = beta
    f_in: int
    f_out: int
    f_in_p: int
    f_out_p: int
    tk: int
    nk: int
    tm_target: int
    vmem_budget: int


def lbrnn_prepare(weight, gamma, beta, *, use_bf16_matmul=False):
    """One-time operand prep: transpose/pad/cast the weight, merge gamma/beta."""
    f_out, f_in = weight.shape
    mm_dtype = jnp.bfloat16 if use_bf16_matmul else jnp.float32
    elt_mm = jnp.dtype(mm_dtype).itemsize

    budget = _vmem_budget_bytes()
    big_vmem = budget >= (80 << 20)
    tm_target = 512 if big_vmem else 256       # weight-stream arithmetic intensity
    tk_target = 1024 if big_vmem else 512

    f_out_p = _round_up(f_out, 128)            # lane-dense output block
    f_in_128 = _round_up(f_in, 128)
    c = f_in_128 // 128                        # K extent in 128-lane chunks

    # Balanced K tiling; shrink tk (never tm / f_out) until the working set fits.
    nk = max(1, _cdiv(f_in_128, tk_target))
    while True:
        per = _cdiv(c, nk)
        nk = _cdiv(c, per)
        per = _cdiv(c, nk)
        tk = per * 128
        if (_vmem_bytes(tm_target, tk, f_out_p, elt_mm, 4, False) <= budget
                or per == 1):
            break
        nk += 1
    f_in_p = nk * tk

    wt = weight.T.astype(mm_dtype)
    if (f_in_p, f_out_p) != (f_in, f_out):     # zero padding is exact for the matmul
        wt = jnp.zeros((f_in_p, f_out_p), mm_dtype).at[:f_in, :f_out].set(wt)
    gb = jnp.zeros((2, f_out_p), jnp.float32)
    gb = gb.at[0, :f_out].set(gamma.astype(jnp.float32))
    gb = gb.at[1, :f_out].set(beta.astype(jnp.float32))

    return LBRNNParams(wt, gb, f_in, f_out, f_in_p, f_out_p, tk, nk,
                       tm_target, budget)


def lbrnn_forward(x, weight=None, gamma=None, beta=None, *, prepared=None,
                  eps=1e-5, use_bf16_matmul=False, out_dtype=None):
    """Fused LBRNN forward: ReLU(LayerNorm(x @ W^T)).

    x:      (..., in_features)
    weight: (out_features, in_features)  -- PyTorch nn.Linear layout, bias=False
    gamma, beta: (out_features,)         -- nn.LayerNorm affine parameters
    prepared: optional LBRNNParams from lbrnn_prepare() (skips per-call prep).
    """
    if prepared is None:
        prepared = lbrnn_prepare(weight, gamma, beta,
                                 use_bf16_matmul=use_bf16_matmul)
    p = prepared

    orig_shape = x.shape
    assert orig_shape[-1] == p.f_in, "last dim of x must equal in_features"
    x2 = x.reshape(-1, p.f_in)
    b = x2.shape[0]

    mm_dtype = p.wt.dtype
    elt_mm = jnp.dtype(mm_dtype).itemsize
    out_dtype = jnp.dtype(out_dtype) if out_dtype is not None else jnp.dtype(jnp.float32)
    elt_out = out_dtype.itemsize
    use_acc = (p.nk > 1) and (out_dtype != jnp.dtype(jnp.float32))

    # Balanced batch tiling (multiple of 8 rows, minimal padding).
    rows8 = _cdiv(b, 8)

    def _tm(n):
        per = _cdiv(rows8, n)
        n = _cdiv(rows8, per)
        return n, _cdiv(rows8, n) * 8

    nb, tm = _tm(max(1, _cdiv(b, p.tm_target)))
    # Give both v7x TensorCores work when the weight is not K-streamed per tile.
    if nb == 1 and p.nk == 1 and rows8 >= 2:
        nb, tm = _tm(2)
    # Feasibility: shrink tm (more batch tiles) as a last resort.
    while (_vmem_bytes(tm, p.tk, p.f_out_p, elt_mm, elt_out, use_acc) > p.vmem_budget
           and nb < rows8):
        nb, tm = _tm(nb + 1)
    b_p = nb * tm

    # x prep with an aligned fast path (no copy when already padded / cast).
    if b_p == b and p.f_in_p == p.f_in and x2.dtype == mm_dtype:
        xp = x2
    else:
        xp = jnp.zeros((b_p, p.f_in_p), mm_dtype).at[:b, :p.f_in].set(
            x2.astype(mm_dtype))

    cost = pl.CostEstimate(
        flops=2 * b * p.f_in * p.f_out + 8 * b * p.f_out,
        transcendentals=b,                      # rsqrt per row
        bytes_accessed=(b_p * p.f_in_p * elt_mm
                        + nb * p.f_in_p * p.f_out_p * elt_mm   # weight re-streamed per batch tile
                        + 2 * p.f_out_p * 4
                        + b_p * p.f_out_p * elt_out),
    )

    kernel = functools.partial(_lbrnn_kernel, eps=eps, f_out_real=p.f_out,
                               f_out_pad=p.f_out_p, nk=p.nk)

    out_p = pl.pallas_call(
        kernel,
        out_shape=jax.ShapeDtypeStruct((b_p, p.f_out_p), out_dtype),
        grid_spec=pltpu.PrefetchScalarGridSpec(
            num_scalar_prefetch=0,
            grid=(nb, p.nk),
            in_specs=[
                pl.BlockSpec((tm, p.tk), lambda i, k: (i, k)),          # x
                pl.BlockSpec((p.tk, p.f_out_p), lambda i, k: (k, 0)),   # W^T
                pl.BlockSpec((2, p.f_out_p), lambda i, k: (0, 0)),      # gamma/beta
            ],
            out_specs=pl.BlockSpec((tm, p.f_out_p), lambda i, k: (i, 0)),
            scratch_shapes=([pltpu.VMEM((tm, p.f_out_p), jnp.float32)]
                            if use_acc else []),
        ),
        compiler_params=pltpu.CompilerParams(
            dimension_semantics=("parallel", "arbitrary"),
            vmem_limit_bytes=int(p.vmem_budget),
        ),
        cost_estimate=cost,
    )(xp, p.wt, p.gb)

    out = out_p
    if b_p != b or p.f_out_p != p.f_out:
        out = out_p[:b, :p.f_out]
    return out.reshape(orig_shape[:-1] + (p.f_out,))


def lbrnn_reference(x, weight, gamma, beta, eps=1e-5):
    y = x @ weight.T
    mean = jnp.mean(y, axis=-1, keepdims=True)
    var = jnp.mean((y - mean) ** 2, axis=-1, keepdims=True)
    y = (y - mean) / jnp.sqrt(var + eps)
    y = y * gamma + beta
    return jnp.maximum(y, 0.0)


# --------------------------------------------------------------------------- #
# demo / self-test
# --------------------------------------------------------------------------- #
if __name__ == "__main__":
    IN_F, OUT_F = 48, 40            # non-128-multiples to exercise the padding path
    x_shape = (2, 8, IN_F)          # (..., in_features); flattened batch = 16

    key = jax.random.PRNGKey(0)
    kx, kw = jax.random.split(key)
    x = jax.random.normal(kx, x_shape, dtype=jnp.float32)
    # kaiming_normal_ (fan_in mode, relu gain): std = sqrt(2 / fan_in); bias=False.
    weight = jax.random.normal(kw, (OUT_F, IN_F), dtype=jnp.float32) * jnp.sqrt(
        2.0 / IN_F)
    gamma = jnp.ones((OUT_F,), dtype=jnp.float32)   # nn.LayerNorm default affine
    beta = jnp.zeros((OUT_F,), dtype=jnp.float32)

    ref = lbrnn_reference(x, weight, gamma, beta)

    # f32 MXU path, weight prepared once and reused across calls.
    params = lbrnn_prepare(weight, gamma, beta)
    out = jax.block_until_ready(lbrnn_forward(x, prepared=params))
    assert out.shape == x_shape[:-1] + (OUT_F,)
    assert jnp.allclose(out, ref, atol=1e-5, rtol=1e-5), "f32 path mismatch vs reference"

    # bf16 MXU operands (f32 accumulation + f32 LayerNorm math): loose check only.
    out_bf16 = jax.block_until_ready(
        lbrnn_forward(x, weight, gamma, beta, use_bf16_matmul=True))
    assert out_bf16.shape == out.shape
    assert bool(jnp.all(jnp.isfinite(out_bf16)))
    assert jnp.allclose(out_bf16, ref, atol=1e-1, rtol=1e-1), "bf16 path drifted"

    print("KERNEL_OK")
</pallas_src>

<mosaic_0001>
module attributes {stable_mosaic.version = 11 : i64} {
  func.func @_lbrnn_kernel(%arg0: i32, %arg1: i32, %arg2: memref<8x128xf32, #tpu.memory_space<vmem>>, %arg3: memref<128x128xf32, #tpu.memory_space<vmem>>, %arg4: memref<2x128xf32, #tpu.memory_space<vmem>>, %arg5: memref<8x128xf32, #tpu.memory_space<vmem>>) attributes {dimension_semantics = [#tpu.dimension_semantics<parallel>, #tpu.dimension_semantics<arbitrary>], iteration_bounds = array<i64: 2, 1>, scalar_prefetch = 0 : i64, scratch_operands = 0 : i64, tpu.core_type = #tpu.core_type<tc>, window_params = [{transform_indices = @transform_0, window_bounds = array<i64: 8, 128>}, {transform_indices = @transform_1, window_bounds = array<i64: 128, 128>}, {pipeline_mode = #tpu.pipeline_mode<synchronous>, transform_indices = @transform_2, window_bounds = array<i64: 2, 128>}, {transform_indices = @transform_3, window_bounds = array<i64: 8, 128>}]} {
    %c0 = arith.constant 0 : index
    %c0_0 = arith.constant 0 : index
    %0 = vector.load %arg2[%c0, %c0_0] : memref<8x128xf32, #tpu.memory_space<vmem>>, vector<8x128xf32>
    %c0_1 = arith.constant 0 : index
    %c0_2 = arith.constant 0 : index
    %1 = vector.load %arg3[%c0_1, %c0_2] : memref<128x128xf32, #tpu.memory_space<vmem>>, vector<128x128xf32>
    %cst = arith.constant dense<0.000000e+00> : vector<8x128xf32>
    %2 = tpu.matmul %0, %1, %cst {dimension_numbers = #tpu.dot_dimension_numbers<[1], [0], [0], [1], [0, 0, 1, 1], [], []>} : vector<8x128xf32>, vector<128x128xf32>, vector<8x128xf32> -> vector<8x128xf32>
    %cst_3 = arith.constant dense<0.000000e+00> : vector<8xf32>
    %3 = vector.multi_reduction <add>, %2, %cst_3 [1] : vector<8x128xf32> to vector<8xf32>
    %4 = vector.shape_cast %3 : vector<8xf32> to vector<8x1xf32>
    %cst_4 = arith.constant 2.500000e-02 : f32
    %5 = vector.broadcast %cst_4 : f32 to vector<8x1xf32>
    %6 = arith.mulf %4, %5 : vector<8x1xf32>
    %7 = vector.broadcast %6 : vector<8x1xf32> to vector<8x128xf32>
    %8 = arith.subf %2, %7 : vector<8x128xf32>
    %9 = tpu.iota {dimensions = array<i32: 1>} : vector<8x128xi32>
    %c40_i32 = arith.constant 40 : i32
    %10 = vector.broadcast %c40_i32 : i32 to vector<8x128xi32>
    %11 = arith.cmpi slt, %9, %10 : vector<8x128xi32>
    %cst_5 = arith.constant 0.000000e+00 : f32
    %12 = vector.broadcast %cst_5 : f32 to vector<8x128xf32>
    %13 = arith.select %11, %8, %12 : vector<8x128xi1>, vector<8x128xf32>
    %14 = arith.mulf %13, %13 : vector<8x128xf32>
    %cst_6 = arith.constant dense<0.000000e+00> : vector<8xf32>
    %15 = vector.multi_reduction <add>, %14, %cst_6 [1] : vector<8x128xf32> to vector<8xf32>
    %16 = vector.shape_cast %15 : vector<8xf32> to vector<8x1xf32>
    %cst_7 = arith.constant 2.500000e-02 : f32
    %17 = vector.broadcast %cst_7 : f32 to vector<8x1xf32>
    %18 = arith.mulf %16, %17 : vector<8x1xf32>
    %c0_8 = arith.constant 0 : index
    %c0_9 = arith.constant 0 : index
    %19 = vector.load %arg4[%c0_8, %c0_9] : memref<2x128xf32, #tpu.memory_space<vmem>>, vector<1x128xf32>
    %cst_10 = arith.constant 9.99999974E-6 : f32
    %20 = vector.broadcast %cst_10 : f32 to vector<8x1xf32>
    %21 = arith.addf %18, %20 : vector<8x1xf32>
    %22 = math.rsqrt %21 : vector<8x1xf32>
    %23 = vector.broadcast %19 : vector<1x128xf32> to vector<8x128xf32>
    %24 = vector.broadcast %22 : vector<8x1xf32> to vector<8x128xf32>
    %25 = arith.mulf %23, %24 : vector<8x128xf32>
    %26 = arith.mulf %13, %25 : vector<8x128xf32>
    %c1 = arith.constant 1 : index
    %c0_11 = arith.constant 0 : index
    %27 = vector.load %arg4[%c1, %c0_11] : memref<2x128xf32, #tpu.memory_space<vmem>>, vector<1x128xf32>
    %28 = vector.broadcast %27 : vector<1x128xf32> to vector<8x128xf32>
    %29 = arith.addf %26, %28 : vector<8x128xf32>
    %cst_12 = arith.constant 0.000000e+00 : f32
    %30 = vector.broadcast %cst_12 : f32 to vector<8x128xf32>
    %31 = arith.maximumf %29, %30 : vector<8x128xf32>
    %c0_13 = arith.constant 0 : index
    %c0_14 = arith.constant 0 : index
    %32 = vector.load %arg5[%c0_13, %c0_14] : memref<8x128xf32, #tpu.memory_space<vmem>>, vector<8x128xf32>
    tpu.vector_store %arg5[%c0_13, %c0_14], %31 {strides = array<i32>} : memref<8x128xf32, #tpu.memory_space<vmem>>, vector<8x128xf32>,
    return
  }
  func.func @transform_0(%arg0: i32, %arg1: i32) -> (i32, i32) {
    %c0_i32 = arith.constant 0 : i32
    return %arg0, %arg1 : i32, i32
  }
  func.func @transform_1(%arg0: i32, %arg1: i32) -> (i32, i32) {
    %c0_i32 = arith.constant 0 : i32
    %c0_i32_0 = arith.constant 0 : i32
    return %arg1, %c0_i32 : i32, i32
  }
  func.func @transform_2(%arg0: i32, %arg1: i32) -> (i32, i32) {
    %c0_i32 = arith.constant 0 : i32
    %c0_i32_0 = arith.constant 0 : i32
    %c0_i32_1 = arith.constant 0 : i32
    return %c0_i32, %c0_i32_0 : i32, i32
  }
  func.func @transform_3(%arg0: i32, %arg1: i32) -> (i32, i32) {
    %c0_i32 = arith.constant 0 : i32
    %c0_i32_0 = arith.constant 0 : i32
    return %arg0, %c0_i32 : i32, i32
  }
}

</mosaic_0001>

<bundles_post_ra>
// kernel: tpu_custom_call.1
= control target key start
LH: loop header
LB: loop body
LE: loop exit
PB: predicated region body
PF: predicated region fallthrough
CT: control target
= control target key end

     0   :  { %8 = vsyncpa [#allocation3], 0  ;;  %s941_s0 = inlined_call_operand.hbm [shape: f32[16,128], index: 0, kind: input, shape index: {}]   ;;  %s942_s1 = inlined_call_operand.hbm [shape: f32[128,128], index: 1, kind: input, shape index: {}]   ;;  %s943_s2 = inlined_call_operand.vmem [shape: f32[2,128], index: 2, kind: input, shape index: {}]   ;;  %s944_s3 = inlined_call_operand.hbm [shape: f32[16,128], index: 3, kind: output, shape index: {}]  }
   0x1   :  { %10 = vsyncpa [#allocation3 + $0x1], 0 }
   0x2   :  { %11 = vsyncpa [#allocation6], 0 }
   0x3   :  { %12 = vsyncpa [#allocation4], 0 }
   0x4   :  { %14 = vsyncpa [#allocation4 + $0x1], 0  ;;  %s761_s12 = smov 0   ;;  %s763_s13 = smov 0  }
   0x5   :  { %s765_s14 = smov 0   ;;  %s767_s15 = smov 0  }
   0x6   :  { %s769_s16 = smov 0   ;;  %s771_s17 = smov 0  }
   0x7 LB: > { %s446_s18 = sadd.s32 4294967295, %s732_s17   ;;  %s447_s19 = sadd.s32 4294967294, %s732_s17   ;;  %s732_s17 = sphi %s771_s17, %s20_s17   ;;  %s728_s16 = sphi %s769_s16, %s962_s16   ;;  %s724_s15 = sphi %s767_s15, %s961_s15   ;;  %s720_s14 = sphi %s765_s14, %s960_s14   ;;  %s716_s13 = sphi %s763_s13, %s959_s13   ;;  %s712_s12 = sphi %s761_s12, %s958_s12  }
   0x8   : > { %p54_p0 = scmp.ne.s32.totalorder %s716_s13, %s712_s12  ;;  %p795_p1 = scmp.eq.s32.totalorder %s446_s18, 0 }
   0x9   : > { %p799_p2 = scmp.eq.s32.totalorder %s446_s18, 1  ;;  %p131_p3 = scmp.eq.s32.totalorder %s447_s19, 1 }
   0xa   : > { %p805_p4 = por %p795_p1, %p54_p0  ;;  %p448_p5 = scmp.ge.s32.totalorder %s732_s17, 1 }
   0xb   : > { %p810_p6 = por %p131_p3, %p54_p0  ;;  %p138_p7 = scmp.lt.s32.totalorder %s732_s17, 3 }
   0xc   : > { %s948_s22 = scalar_select %p805_p4, 1, 0 }
   0xd   : > { %s949_s23 = scalar_select %p810_p6, 1, 0 }
   0xe   : > { %p815_p8 = pnand %p448_p5, %p138_p7  ;;  %s734_s25 = smov [#allocation5]  }
   0xf   : > { %s153_s26 = sshll.u32 %s734_s25, 4  ;;  %s32_s28 = sadd.s32 1, %s728_s16  ;;  %s154_s26 = int_to_ptr.vmem [resolvable:$true] %s153_s26 }
  0x10   : > { %p523_p9 = pneg %p815_p8  ;;  %s605_s29 = scalar_lea.vmem %s154_s26, 2048 }
  0x11   : > { %p606_p13 = scmp.ne.s32.totalorder %s154_s26, %s605_s29  ;;  %p613_p5 = scmp.lt.s32.totalorder %s154_s26, %s154_s26 }
  0x12   : > { %p824_p11 = pnand %p523_p9, %p795_p1  ;;  %p614_p7 = scmp.lt.s32.totalorder %s605_s29, %s605_s29 }
  0x14   : > { %p596_p12 = pneg %p824_p11  ;;  %p615_p6 = por %p614_p7, %p613_p5 }
  0x16   : > { %p608_p0 = pnand %p606_p13, %p596_p12 }
  0x18   : > { %p609_p3 = pneg %p608_p0 }
  0x1a   : > { %p616_p4 = pnand %p615_p6, %p609_p3 }
  0x1c   : > { %619 = shalt.err (!%p616_p4)
}
  0x1d   : > { %s735_s30 = smov 128   ;;  %s736_s4 = smov 8  }
  0x1e   : > { %526 = dma.hbm_to_vmem [thread:$0]  (!%p824_p11), %s942_s1, 2048, %s154_s26, [#allocation6], %s735_s30, %s735_s30, %s736_s4  }
  0x1f   : > { %p34_p6 = scmp.ge.s32.totalorder %s32_s28, 2  ;;  %s41_s7 = sadd.s32 1, %s720_s14 }
  0x20   : > { %p48_p4 = scmp.ne.s32.totalorder %s720_s14, %s716_s13  ;;  %p49_p9 = scmp.eq.s32.totalorder %s732_s17, 0 }
  0x21   : > { %s964_s28 = smov (%p34_p6, %s32_s28), 0  ;;  %p536_p0 = scmp.lt.s32.totalorder %s732_s17, 2 }
  0x22   : > { %p842_p12 = por %p49_p9, %p48_p4  ;;  %p848_p13 = por %p799_p2, %p48_p4 }
  0x23   : > { %s36_s10 = ssub.s32 %s728_s16, %s964_s28  ;;  %s170_s11 = sand.u32 1, %s720_s14  }
  0x24   : > { %p39_p11 = scmp.eq.s32.totalorder %s36_s10, 0  ;;  %s451_s18 = sshll.u32 %s170_s11, 3 }
  0x25   : > { %s452_s25 = sshll.u32 %s728_s16, 7  ;;  %s174_s30 = scalar_lea.vmem [#allocation2], %s451_s18 }
  0x26   : > { %s857_s19 = scalar_select %p39_p11, %s720_s14, %s41_s7  }
  0x27   : > { %s180_s29 = scalar_lea.hbm %s941_s0, %s452_s25  ;;  %s182_s4 = sshll.u32 %s174_s30, 4  ;;  %s183_s4 = int_to_ptr.vmem [resolvable:$true] %s182_s4 }
  0x28   : > { %p865_p2 = pnand %p536_p0, %p842_p12  ;;  %s171_s5 = scalar_lea.sflag [#allocation3], %s170_s11 }
  0x29   : > { %s633_s6 = scalar_lea.vmem %s183_s4, 128  ;;  %s737_s7 = smov [#allocation2]  }
  0x2a   : > { %p622_p3 = pneg %p865_p2  ;;  %p634_p5 = scmp.ne.s32.totalorder %s183_s4, %s633_s6 }
  0x2b   : > { %s638_s10 = sshll.u32 %s737_s7, 4  ;;  %s639_s10 = int_to_ptr.vmem [resolvable:$false] %s638_s10 }
  0x2c   : > { %p636_p7 = pnand %p634_p5, %p622_p3  ;;  %s640_s25 = scalar_lea.vmem %s639_s10, 256 }
  0x2d   : > { %p641_p4 = scmp.lt.s32.totalorder %s183_s4, %s639_s10  ;;  %p642_p9 = scmp.lt.s32.totalorder %s640_s25, %s633_s6 }
  0x2e   : > { %p637_p6 = pneg %p636_p7 }
  0x2f   : > { %p643_p11 = por %p642_p9, %p641_p4 }
  0x31   : > { %p644_p10 = pnand %p643_p11, %p637_p6 }
  0x33   : > { %647 = shalt.err (!%p644_p10)
}
  0x34   : > { %530 = dma.hbm_to_vmem [thread:$0]  (!%p865_p2), %s180_s29, 128, %s183_s4, %s171_s5  }
  0x35   : > { %191 = sbr.rel (%p815_p8) target bundleno = 609 (0x261), region = 32  ;;  %s876_s8 = sand.u32 (!%p815_p8), 1, %s716_s13  }
  0x36   : > { %s454_s11 = sshll.u32 (!%p815_p8), %s876_s8, 3  ;;  %s194_s18 = scalar_lea.sflag (!%p815_p8), [#allocation3], %s876_s8 }
  0x37   : > { %s882_s26 = scalar_lea.vmem (!%p815_p8), [#allocation2], %s454_s11  ;;  %p955_p12 = scmp.ne.s32.totalorder (!%p815_p8), %s948_s22, 0 }
  0x3a   : > { %699 = dma.done.wait (%p955_p12), %s194_s18, 128  }
  0x3b   : > { %701 = vsyncadd (%p955_p12), %s194_s18, 4294967168 }
  0x3c   : > { %703 = dma.done.wait (%p795_p1), [#allocation6], 2048  }
  0x3d   : > { %705 = vsyncadd (%p795_p1), [#allocation6], 4294965248  ;;  %v738_v0 = vmov 0.0   ;;  %vm739_vm0 = vmmov 0   ;;  %v241_v1 = vld [vmem:[#allocation5 + $0x78] sm:$0xff]  ;;  %v240_v2 = vld [vmem:[#allocation5 + $0x70] sm:$0xff]  ;;  %v316_v20 = vlaneseq }
  0x3e   : > { %480 = vmatprep.subr.mxu0 %v738_v0  ;;  %512 = vmatprep.mubr.msk.f32.mxu0 %vm739_vm0, %v738_v0  ;;  %v239_v3 = vld [vmem:[#allocation5 + $0x68] sm:$0xff]  ;;  %v238_v4 = vld [vmem:[#allocation5 + $0x60] sm:$0xff]  ;;  %v237_v5 = vld [vmem:[#allocation5 + $0x58] sm:$0xff]  ;;  %s460_s29 = sshll.u32 %s724_s15, 7  ;;  %s223_s30 = scalar_lea.vmem [#allocation7], %s454_s11 }
  0x3f   : > { %481 = vmatpush3.msra.mxu0 %v241_v1  ;;  %v236_v6 = vld [vmem:[#allocation5 + $0x50] sm:$0xff]  ;;  %v235_v7 = vld [vmem:[#allocation5 + $0x48] sm:$0xff]  ;;  %v234_v8 = vld [vmem:[#allocation5 + $0x40] sm:$0xff]  ;;  %v317_v21 = vand.u32 127, %v316_v20  ;;  %s355_s4 = sshll.u32 %s223_s30, 4  ;;  %s353_s6 = scalar_lea.hbm %s944_s3, %s460_s29  ;;  %s356_s4 = int_to_ptr.vmem [resolvable:$true] %s355_s4 }
  0x40   : > { %482 = vmatprep.subr.mxu0 %v738_v0  ;;  %v233_v9 = vld [vmem:[#allocation5 + $0x38] sm:$0xff]  ;;  %v232_v10 = vld [vmem:[#allocation5 + $0x30] sm:$0xff]  ;;  %v231_v11 = vld [vmem:[#allocation5 + $0x28] sm:$0xff]  ;;  %s342_s7 = scalar_lea.sflag [#allocation4], %s876_s8  ;;  %s648_s10 = scalar_lea.vmem %s356_s4, 128 }
  0x41   : > { %483 = vmatpush3.msra.mxu0 %v240_v2  ;;  %v230_v12 = vld [vmem:[#allocation5 + $0x20] sm:$0xff]  ;;  %v229_v13 = vld [vmem:[#allocation5 + $0x18] sm:$0xff]  ;;  %v228_v14 = vld [vmem:[#allocation5 + $0x10] sm:$0xff]  ;;  %vm318_vm1 = vcmp.lt.s32.totalorder %v317_v21, 40  ;;  %p649_p1 = scmp.ne.s32.totalorder %s356_s4, %s648_s10  ;;  %s740_s25 = smov [#allocation7]  }
  0x42   : > { %484 = vmatprep.subr.mxu0 %v738_v0  ;;  %v227_v15 = vld [vmem:[#allocation5 + $0x8] sm:$0xff]  ;;  %v226_v16 = vld [vmem:[#allocation5] sm:$0xff]  ;;  %v225_v17 = vld [vmem:[%s882_s26] sm:$0xff]  ;;  %s652_s18 = sshll.u32 %s740_s25, 4  ;;  %s653_s18 = int_to_ptr.vmem [resolvable:$false] %s652_s18 }
  0x43   : > { %485 = vmatpush3.msra.mxu0 %v239_v3  ;;  %v457_v30 = vld [vmem:[%s943_s2] ss:$0 sm:$0xff]  ;;  %v458_v33 = vld [vmem:[%s943_s2 + $0x1] ss:$0 sm:$0xff]  ;;  %p650_p8 = pnand %p649_p1, %p848_p13  ;;  %s654_s15 = scalar_lea.vmem %s653_s18, 256 }
  0x44   : > { %486 = vmatprep.subr.mxu0 %v738_v0  ;;  %p655_p0 = scmp.lt.s32.totalorder %s356_s4, %s653_s18  ;;  %p656_p2 = scmp.lt.s32.totalorder %s654_s15, %s648_s10 }
  0x45   : > { %487 = vmatpush3.msra.mxu0 %v238_v4  ;;  %p651_p10 = pneg %p650_p8 }
  0x46   : > { %488 = vmatprep.subr.mxu0 %v738_v0  ;;  %p657_p3 = por %p656_p2, %p655_p0 }
  0x47   : > { %489 = vmatpush3.msra.mxu0 %v237_v5 }
  0x48   : > { %490 = vmatprep.subr.mxu0 %v738_v0  ;;  %p658_p5 = pnand %p657_p3, %p651_p10 }
  0x49   : > { %491 = vmatpush3.msra.mxu0 %v236_v6 }
  0x4a   : > { %492 = vmatprep.subr.mxu0 %v738_v0 }
  0x4b   : > { %493 = vmatpush3.msra.mxu0 %v235_v7 }
  0x4c   : > { %494 = vmatprep.subr.mxu0 %v738_v0 }
  0x4d   : > { %495 = vmatpush3.msra.mxu0 %v234_v8 }
  0x4e   : > { %496 = vmatprep.subr.mxu0 %v738_v0 }
  0x4f   : > { %497 = vmatpush3.msra.mxu0 %v233_v9 }
  0x50   : > { %498 = vmatprep.subr.mxu0 %v738_v0 }
  0x51   : > { %499 = vmatpush3.msra.mxu0 %v232_v10 }
  0x52   : > { %500 = vmatprep.subr.mxu0 %v738_v0 }
  0x53   : > { %501 = vmatpush3.msra.mxu0 %v231_v11 }
  0x54   : > { %502 = vmatprep.subr.mxu0 %v738_v0 }
  0x55   : > { %503 = vmatpush3.msra.mxu0 %v230_v12 }
  0x56   : > { %504 = vmatprep.subr.mxu0 %v738_v0 }
  0x57   : > { %505 = vmatpush3.msra.mxu0 %v229_v13 }
  0x58   : > { %506 = vmatprep.subr.mxu0 %v738_v0 }
  0x59   : > { %507 = vmatpush3.msra.mxu0 %v228_v14 }
  0x5a   : > { %508 = vmatprep.subr.mxu0 %v738_v0 }
  0x5b   : > { %509 = vmatpush3.msra.mxu0 %v227_v15 }
  0x5c   : > { %510 = vmatprep.subr.mxu0 %v738_v0 }
  0x5d   : > { %511 = vmatpush3.msra.mxu0 %v226_v16 }
  0x5e   : > { %513 = vmatmul.mubr.f32.vlgmr.msra.gmra.mxu0 %v225_v17 }
 0x11e   : > { %v308_v18 = vpop.f32.mrf.mxu0 }
 0x11f   : > { %312 = vadd.xlane.f32.xlu0 %v308_v18 }
 0x120   : > { %v514_v19 = vpop.f32.mrf.mxu0 }
 0x1a8   : > { %v313_v22 = vpop.xlane.xlu0 %312 }
 0x1a9   : > { %v314_v23 = vmul.f32 0.025, %v313_v22 }
 0x1ab   : > { %v315_v24 = vsub.f32 %v308_v18, %v314_v23 }
 0x1ad   : > { %v319_v25 = vsel %vm318_vm1, %v315_v24, 0.0 }
 0x1ae   : > { %v320_v26 = vmul.f32 %v319_v25, %v319_v25 }
 0x1b0   : > { %321 = vadd.xlane.f32.xlu0 %v320_v26 }
 0x239   : > { %v322_v27 = vpop.xlane.xlu0 %321 }
 0x23a   : > { %v323_v28 = vmul.f32 0.025, %v322_v27 }
 0x23c   : > { %v325_v29 = vadd.f32 1e-05, %v323_v28 }
 0x23e   : > { %592 = vrsqrt.f32 %v325_v29 }
 0x24b   : > { %v593_v31 = vpop.eup %592 }
 0x24c   : > { %v331_v32 = vmul.f32 %v593_v31, %v457_v30 }
 0x24e   : > { %v332_v34 = vmul.f32 %v331_v32, %v319_v25 }
 0x250   : > { %v338_v35 = vadd.f32 %v458_v33, %v332_v34 }
 0x252   : > { %v339_v36 = vmax.f32 %v338_v35, 0.0 }
 0x254   : > { %340 = vst [vmem:[%s223_s30] sm:$0xff] %v339_v36 }
 0x255   : > { %661 = shalt.err (!%p658_p5)
}
 0x256   : > { %s662_s11 = scalar_lea.hbm %s353_s6, 128  ;;  %s666_s20 = scalar_lea.hbm %s944_s3, 256 }
 0x257   : > { %p663_p7 = scmp.ne.s32.totalorder %s353_s6, %s662_s11  ;;  %p667_p9 = scmp.lt.s32.totalorder %s353_s6, %s944_s3 }
 0x258   : > { %p668_p11 = scmp.lt.s32.totalorder %s666_s20, %s662_s11 }
 0x259   : > { %p664_p6 = pnand %p663_p7, %p848_p13 }
 0x25a   : > { %p669_p12 = por %p668_p11, %p667_p9 }
 0x25b   : > { %p665_p4 = pneg %p664_p6 }
 0x25d   : > { %p670_p1 = pnand %p669_p12, %p665_p4 }
 0x25f   : > { %673 = shalt.err (!%p670_p1)
}
 0x260   : > { %521 = dma.vmem_to_hbm [thread:$0]  (%p848_p13), %s356_s4, 128, %s353_s6, %s342_s7  }
 0x261 PF: > { %s367_s27 = sand.u32 1, %s712_s12   ;;  %p956_p8 = scmp.ne.s32.totalorder %s949_s23, 0 }
 0x262   : > { %p957_p10 = scmp.ge.s32.totalorder %s732_s17, 2  ;;  %s368_s29 = scalar_lea.sflag [#allocation4], %s367_s27 }
 0x264   : > { %p532_p0 = pnand %p957_p10, %p956_p8 }
 0x266   : > { %p533_p2 = pneg %p532_p0 }
 0x268   : > { %707 = dma.done.wait (%p533_p2), %s368_s29, 128  }
 0x269   : > { %709 = vsyncadd (%p533_p2), %s368_s29, 4294967168  ;;  %s20_s17 = sadd.s32 1, %s732_s17   ;;  %s958_s12 = smov %s716_s13 }
 0x26a   : > { %p17_p3 = scmp.ge.s32.totalorder %s20_s17, 4   ;;  %s959_s13 = smov %s720_s14 }
 0x26b   : > { %s960_s14 = smov %s857_s19  ;;  %s961_s15 = smov %s728_s16 }
 0x26c   : > { %s962_s16 = smov %s964_s28  ;;  %19 = sbr.rel (!%p17_p3) target bundleno = 7 (0x7), region = 82 }
 0x271   :  { %373 = vsyncpa [#allocation3], 1 }
 0x272   :  { %375 = vsyncpa [#allocation3 + $0x1], 1 }
 0x273   :  { %376 = vsyncpa [#allocation6], 1 }
 0x274   :  { %377 = vsyncpa [#allocation4], 1 }
 0x275   :  { %379 = vsyncpa [#allocation4 + $0x1], 1 }

</bundles_post_ra>
